<compile_context>
chip_gen: v6e
topology: v6e:2x2x1
jax: 0.10.0
libtpu: 0.0.40
codegen_flags: <defaults>
</compile_context>

<pallas_src>
import functools
import math

import jax
import jax.numpy as jnp
from jax import lax
from jax.experimental import pallas as pl
from jax.experimental.pallas import tpu as pltpu


def _is_static_scalar(v):
    return isinstance(v, (int, float)) and not isinstance(v, bool)


# ---------------------------------------------------------------------------
# 1. Fused AngularLogit head:  scale * (normalize(x) @ normalize(W).T - m*onehot)
# ---------------------------------------------------------------------------
def _angular_logit_plain_kernel(x_ref, w_ref, o_ref, *, scale):
    xb = x_ref[...].astype(jnp.float32)                      # (tb, D)
    wb = w_ref[...].astype(jnp.float32)                      # (tc, D)
    xb = xb / jnp.maximum(jnp.sqrt(jnp.sum(xb * xb, axis=1, keepdims=True)), 1e-12)
    wb = wb / jnp.maximum(jnp.sqrt(jnp.sum(wb * wb, axis=1, keepdims=True)), 1e-12)
    cos = lax.dot_general(xb, wb, (((1,), (1,)), ((), ())),
                          preferred_element_type=jnp.float32)  # (tb, tc)
    o_ref[...] = (scale * cos).astype(o_ref.dtype)


def _angular_logit_margin_kernel(lab_ref, x_ref, w_ref, o_ref, *, scale, margin):
    xb = x_ref[...].astype(jnp.float32)
    wb = w_ref[...].astype(jnp.float32)
    xb = xb / jnp.maximum(jnp.sqrt(jnp.sum(xb * xb, axis=1, keepdims=True)), 1e-12)
    wb = wb / jnp.maximum(jnp.sqrt(jnp.sum(wb * wb, axis=1, keepdims=True)), 1e-12)
    cos = lax.dot_general(xb, wb, (((1,), (1,)), ((), ())),
                          preferred_element_type=jnp.float32)
    tb, tc = o_ref.shape
    cols = pl.program_id(1) * tc + lax.broadcasted_iota(jnp.int32, (tb, tc), 1)
    hit = (cols == lab_ref[...]).astype(jnp.float32)          # lab_ref: (tb, 1)
    o_ref[...] = (scale * (cos - margin * hit)).astype(o_ref.dtype)


def angular_logit(x, weight, labels=None, margin=0.0, scale=1.0, *,
                  block_b=256, block_c=256):
    """Fused AngularLogit.forward (+ optional AngularMargin epilogue).

    x: (B, D) features, weight: (C, D) class weights, labels: optional (B,) int.
    Returns scale * (normalize(x) @ normalize(weight).T - margin * onehot(labels)).
    With defaults (margin=0, scale=1, labels=None) this is exactly the PyTorch
    AngularLogit.forward.  scale/margin must be static Python numbers here.
    """
    assert _is_static_scalar(margin) and _is_static_scalar(scale), (
        "angular_logit folds scale/margin as compile-time constants; "
        "use angular_margin(_onehot) for traced values")
    B, D = x.shape
    C, D2 = weight.shape
    assert D == D2
    tb = B if B <= block_b else block_b          # == full dim or multiple of 8
    tc = C if C <= block_c else block_c          # == full dim or multiple of 128
    grid = (pl.cdiv(B, tb), pl.cdiv(C, tc))
    itemsize = jnp.dtype(x.dtype).itemsize
    cost = pl.CostEstimate(
        flops=2 * B * C * D, transcendentals=0,
        bytes_accessed=(B * D + C * D + B * C) * itemsize)

    x_spec = pl.BlockSpec((tb, D), lambda i, j: (i, 0))
    w_spec = pl.BlockSpec((tc, D), lambda i, j: (j, 0))
    out_spec = pl.BlockSpec((tb, tc), lambda i, j: (i, j))
    params = pltpu.CompilerParams(dimension_semantics=("parallel", "parallel"))

    if labels is None and margin == 0.0:
        kernel = functools.partial(_angular_logit_plain_kernel, scale=float(scale))
        return pl.pallas_call(
            kernel,
            out_shape=jax.ShapeDtypeStruct((B, C), x.dtype),
            grid=grid, in_specs=[x_spec, w_spec], out_specs=out_spec,
            compiler_params=params, cost_estimate=cost,
        )(x, weight)

    labels2 = (jnp.full((B, 1), -1, jnp.int32) if labels is None
               else labels.reshape(B, 1).astype(jnp.int32))
    lab_spec = pl.BlockSpec((tb, 1), lambda i, j: (i, 0))
    kernel = functools.partial(_angular_logit_margin_kernel,
                               scale=float(scale), margin=float(margin))
    return pl.pallas_call(
        kernel,
        out_shape=jax.ShapeDtypeStruct((B, C), x.dtype),
        grid=grid, in_specs=[lab_spec, x_spec, w_spec], out_specs=out_spec,
        compiler_params=params, cost_estimate=cost,
    )(labels2, x, weight)


# ---------------------------------------------------------------------------
# 2a. Dense-targets AngularMargin epilogue: res = s*outputs - (s*m)*targets
# ---------------------------------------------------------------------------
def _am_kernel_const(out_ref, tgt_ref, res_ref, *, s, sm):
    o = out_ref[...].astype(jnp.float32)
    t = tgt_ref[...].astype(jnp.float32)
    res_ref[...] = (s * o - sm * t).astype(res_ref.dtype)


def _am_kernel_smem(out_ref, tgt_ref, sc_ref, res_ref):
    s = sc_ref[0]
    sm = sc_ref[1]
    o = out_ref[...].astype(jnp.float32)
    t = tgt_ref[...].astype(jnp.float32)
    res_ref[...] = (s * o - sm * t).astype(res_ref.dtype)


def angular_margin(outputs, targets, margin=0.0, scale=1.0, *,
                   block_bytes=2 << 20, donate_outputs=False):
    """Pallas TPU implementation of AngularMargin's logits transform.

    Returns scale * (outputs - margin * targets); outputs/targets same shape & dtype.
    """
    assert outputs.shape == targets.shape
    assert outputs.dtype == targets.dtype
    orig_shape = outputs.shape
    dtype = outputs.dtype
    n = math.prod(orig_shape) if orig_shape else 1
    itemsize = jnp.dtype(dtype).itemsize
    sublane = 8 * max(1, 4 // itemsize)          # 8 f32 / 16 bf16 / 32 int8 rows

    # Lane-dense 2-D view, never via pad/slice copies:
    #  * numel % 128 == 0 -> flatten to (rows, lane) with lane in {1024..128}.
    #  * otherwise        -> tile the natural (prod(leading), last_dim) view
    #    with a ragged grid (Pallas masks the ragged block's writes).
    if n % 128 == 0:
        lane = 128
        for cand in (1024, 512, 256):
            if n % cand == 0:
                lane = cand
                break
        rows = n // lane
    else:
        lane = orig_shape[-1] if orig_shape else 1
        rows = n // lane
    o2 = outputs.reshape(rows, lane)
    t2 = targets.reshape(rows, lane)

    # Block sizing: ~block_bytes per input block (3 arrays x 2 buffers fits the
    # default scoped VMEM on every generation at the 2 MiB default).
    if lane * itemsize * sublane <= block_bytes:
        tc = lane
        tr = max(sublane, (block_bytes // (lane * itemsize)) // sublane * sublane)
    elif lane % 128 == 0:
        tc = max(128, min(lane, (block_bytes // (sublane * itemsize)) // 128 * 128))
        tr = sublane
    else:
        tc = lane        # very wide non-128-multiple trailing dim: minimal rows
        tr = sublane

    # v7x: keep >= ~8 grid steps along rows (2-TensorCore split) as long as the
    # resulting blocks stay >= 256 KiB; otherwise the problem is tiny anyway.
    cap = (pl.cdiv(rows, 8) // sublane) * sublane
    if cap >= sublane and cap * tc * itemsize >= (256 << 10):
        tr = min(tr, cap)
    if rows <= tr:
        tr = rows        # full dim -> always a legal block shape

    grid = (pl.cdiv(rows, tr), pl.cdiv(lane, tc))
    cost = pl.CostEstimate(flops=2 * n, transcendentals=0,
                           bytes_accessed=3 * n * itemsize)

    data_spec = pl.BlockSpec((tr, tc), lambda i, j: (i, j))
    common = dict(
        out_shape=jax.ShapeDtypeStruct((rows, lane), dtype),
        grid=grid,
        out_specs=pl.BlockSpec((tr, tc), lambda i, j: (i, j)),
        compiler_params=pltpu.CompilerParams(
            dimension_semantics=("parallel", "parallel")),
        cost_estimate=cost,
    )
    if donate_outputs:
        common["input_output_aliases"] = {0: 0}

    if _is_static_scalar(margin) and _is_static_scalar(scale):
        kernel = functools.partial(_am_kernel_const,
                                   s=float(scale), sm=float(scale) * float(margin))
        res = pl.pallas_call(kernel, in_specs=[data_spec, data_spec],
                             **common)(o2, t2)
    else:
        s32 = jnp.asarray(scale, dtype=jnp.float32)
        m32 = jnp.asarray(margin, dtype=jnp.float32)
        scalars = jnp.stack([s32, s32 * m32])
        res = pl.pallas_call(
            _am_kernel_smem,
            in_specs=[data_spec, data_spec, pl.BlockSpec(memory_space=pltpu.SMEM)],
            **common)(o2, t2, scalars)

    return res.reshape(orig_shape)


# ---------------------------------------------------------------------------
# 2b. One-hot fast path: targets = one_hot(labels) -> no dense targets read.
# ---------------------------------------------------------------------------
def _am_onehot_kernel_const(out_ref, lab_ref, res_ref, *, s, sm):
    tb, tc = res_ref.shape
    cols = pl.program_id(1) * tc + lax.broadcasted_iota(jnp.int32, (tb, tc), 1)
    hit = cols == lab_ref[...]                         # (tb, 1) labels broadcast
    o = out_ref[...].astype(jnp.float32)
    res_ref[...] = (s * o - jnp.where(hit, jnp.float32(sm),
                                      jnp.float32(0.0))).astype(res_ref.dtype)


def _am_onehot_kernel_smem(out_ref, lab_ref, sc_ref, res_ref):
    s = sc_ref[0]
    sm = sc_ref[1]
    tb, tc = res_ref.shape
    cols = pl.program_id(1) * tc + lax.broadcasted_iota(jnp.int32, (tb, tc), 1)
    hit = cols == lab_ref[...]
    o = out_ref[...].astype(jnp.float32)
    res_ref[...] = (s * o - jnp.where(hit, sm, jnp.float32(0.0))).astype(res_ref.dtype)


def angular_margin_onehot(outputs, labels, margin=0.0, scale=1.0, *,
                          block_b=256, block_c=1024, donate_outputs=False):
    """Same op when targets = one_hot(labels): skips the dense targets tensor."""
    B, C = outputs.shape
    tb = B if B <= block_b else block_b
    tc = C if C <= block_c else block_c
    labels2 = labels.reshape(B, 1).astype(jnp.int32)
    itemsize = jnp.dtype(outputs.dtype).itemsize
    grid = (pl.cdiv(B, tb), pl.cdiv(C, tc))
    cost = pl.CostEstimate(flops=2 * B * C, transcendentals=0,
                           bytes_accessed=2 * B * C * itemsize + B * 4)

    logit_spec = pl.BlockSpec((tb, tc), lambda i, j: (i, j))
    lab_spec = pl.BlockSpec((tb, 1), lambda i, j: (i, 0))
    common = dict(
        out_shape=jax.ShapeDtypeStruct((B, C), outputs.dtype),
        grid=grid,
        out_specs=pl.BlockSpec((tb, tc), lambda i, j: (i, j)),
        compiler_params=pltpu.CompilerParams(
            dimension_semantics=("parallel", "parallel")),
        cost_estimate=cost,
    )
    if donate_outputs:
        common["input_output_aliases"] = {0: 0}

    if _is_static_scalar(margin) and _is_static_scalar(scale):
        kernel = functools.partial(_am_onehot_kernel_const,
                                   s=float(scale), sm=float(scale) * float(margin))
        return pl.pallas_call(kernel, in_specs=[logit_spec, lab_spec],
                              **common)(outputs, labels2)

    s32 = jnp.asarray(scale, dtype=jnp.float32)
    m32 = jnp.asarray(margin, dtype=jnp.float32)
    scalars = jnp.stack([s32, s32 * m32])
    return pl.pallas_call(
        _am_onehot_kernel_smem,
        in_specs=[logit_spec, lab_spec, pl.BlockSpec(memory_space=pltpu.SMEM)],
        **common)(outputs, labels2, scalars)


def angular_margin_ref(outputs, targets, margin=0.0, scale=1.0):
    # Pure-JAX reference mirroring the PyTorch semantics exactly.
    return scale * (outputs - margin * targets)


if __name__ == "__main__":
    key = jax.random.PRNGKey(0)
    k1, k2, k3, k4 = jax.random.split(key, 4)
    margin, scale = 0.2, 30.0

    # ---- AngularMargin epilogue, 128-divisible numel (flattened lane path) ----
    B, C = 8, 32
    outputs = jax.random.normal(k1, (B, C), dtype=jnp.float32)
    labels = jax.random.randint(k2, (B,), 0, C)
    targets = jax.nn.one_hot(labels, C, dtype=jnp.float32)
    want = angular_margin_ref(outputs, targets, margin, scale)

    got = jax.jit(functools.partial(angular_margin, margin=margin, scale=scale))(
        outputs, targets)
    jax.block_until_ready(got)
    assert got.shape == want.shape and got.dtype == want.dtype
    assert jnp.allclose(got, want, atol=1e-5, rtol=1e-5)

    # ---- non-128-divisible shape: ragged 2-D path (no pad/slice copies) ----
    B2, C2 = 6, 37
    o2 = jax.random.normal(k3, (B2, C2), dtype=jnp.float32)
    l2 = jax.random.randint(k4, (B2,), 0, C2)
    t2 = jax.nn.one_hot(l2, C2, dtype=jnp.float32)
    want2 = angular_margin_ref(o2, t2, margin, scale)
    got2 = jax.jit(functools.partial(angular_margin, margin=margin, scale=scale))(o2, t2)
    jax.block_until_ready(got2)
    assert jnp.allclose(got2, want2, atol=1e-5, rtol=1e-5)

    # ---- traced scale/margin -> SMEM scalar path ----
    am_traced = jax.jit(lambda o, t, m, s: angular_margin(o, t, margin=m, scale=s))
    got3 = am_traced(outputs, targets, jnp.float32(margin), jnp.float32(scale))
    jax.block_until_ready(got3)
    assert jnp.allclose(got3, want, atol=1e-5, rtol=1e-5)

    # ---- one-hot fast path (integer labels, no dense targets read) ----
    got4 = jax.jit(functools.partial(angular_margin_onehot, margin=margin,
                                     scale=scale))(outputs, labels)
    jax.block_until_ready(got4)
    assert jnp.allclose(got4, want, atol=1e-5, rtol=1e-5)

    # ---- fused AngularLogit head: cosine logits + fused margin epilogue ----
    Bh, Dh, Ch = 8, 32, 20
    x = jax.random.normal(k1, (Bh, Dh), dtype=jnp.float32)
    w = jax.random.normal(k2, (Ch, Dh), dtype=jnp.float32)
    lab = jax.random.randint(k3, (Bh,), 0, Ch)

    def _norm(v):
        return v / jnp.maximum(jnp.linalg.norm(v, axis=1, keepdims=True), 1e-12)

    cos_ref = _norm(x) @ _norm(w).T                       # == AngularLogit.forward
    cos = jax.jit(angular_logit)(x, w)
    jax.block_until_ready(cos)
    assert jnp.allclose(cos, cos_ref, atol=1e-5, rtol=1e-5)

    fused_ref = scale * (cos_ref - margin * jax.nn.one_hot(lab, Ch, dtype=jnp.float32))
    fused = jax.jit(functools.partial(angular_logit, margin=margin, scale=scale))(
        x, w, lab)
    jax.block_until_ready(fused)
    assert jnp.allclose(fused, fused_ref, atol=1e-4, rtol=1e-4)

    print("KERNEL_OK")
</pallas_src>

<mosaic_0001>
module attributes {stable_mosaic.version = 11 : i64} {
  func.func @_am_kernel_const(%arg0: i32, %arg1: i32, %arg2: memref<1x256xf32, #tpu.memory_space<vmem>>, %arg3: memref<1x256xf32, #tpu.memory_space<vmem>>, %arg4: memref<1x256xf32, #tpu.memory_space<vmem>>) attributes {dimension_semantics = [#tpu.dimension_semantics<parallel>, #tpu.dimension_semantics<parallel>], iteration_bounds = array<i64: 1, 1>, scalar_prefetch = 0 : i64, scratch_operands = 0 : i64, tpu.core_type = #tpu.core_type<tc>, window_params = [{transform_indices = @transform_0, window_bounds = array<i64: 1, 256>}, {transform_indices = @transform_1, window_bounds = array<i64: 1, 256>}, {transform_indices = @transform_2, window_bounds = array<i64: 1, 256>}]} {
    %c0 = arith.constant 0 : index
    %c0_0 = arith.constant 0 : index
    %0 = vector.load %arg2[%c0, %c0_0] : memref<1x256xf32, #tpu.memory_space<vmem>>, vector<1x256xf32>
    %c0_1 = arith.constant 0 : index
    %c0_2 = arith.constant 0 : index
    %1 = vector.load %arg3[%c0_1, %c0_2] : memref<1x256xf32, #tpu.memory_space<vmem>>, vector<1x256xf32>
    %cst = arith.constant 3.000000e+01 : f32
    %2 = vector.broadcast %cst : f32 to vector<1x256xf32>
    %3 = arith.mulf %2, %0 : vector<1x256xf32>
    %cst_3 = arith.constant 6.000000e+00 : f32
    %4 = vector.broadcast %cst_3 : f32 to vector<1x256xf32>
    %5 = arith.mulf %4, %1 : vector<1x256xf32>
    %6 = arith.subf %3, %5 : vector<1x256xf32>
    %c0_4 = arith.constant 0 : index
    %c0_5 = arith.constant 0 : index
    %7 = vector.load %arg4[%c0_4, %c0_5] : memref<1x256xf32, #tpu.memory_space<vmem>>, vector<1x256xf32>
    tpu.vector_store %arg4[%c0_4, %c0_5], %6 {strides = array<i32>} : memref<1x256xf32, #tpu.memory_space<vmem>>, vector<1x256xf32>,
    return
  }
  func.func @transform_0(%arg0: i32, %arg1: i32) -> (i32, i32) {
    %c0_i32 = arith.constant 0 : i32
    return %arg0, %arg1 : i32, i32
  }
  func.func @transform_1(%arg0: i32, %arg1: i32) -> (i32, i32) {
    %c0_i32 = arith.constant 0 : i32
    return %arg0, %arg1 : i32, i32
  }
  func.func @transform_2(%arg0: i32, %arg1: i32) -> (i32, i32) {
    %c0_i32 = arith.constant 0 : i32
    return %arg0, %arg1 : i32, i32
  }
}

</mosaic_0001>

<bundles_post_ra>
// kernel: angular_margin.1
= control target key start
LH: loop header
LB: loop body
LE: loop exit
PB: predicated region body
PF: predicated region fallthrough
CT: control target
= control target key end

     0   :  { %v16_v0 = vlaneseq  ;;  %s49_s0 = inlined_call_operand.vmem [shape: f32[1,256], index: 0, kind: input, shape index: {}]   ;;  %s50_s1 = inlined_call_operand.vmem [shape: f32[1,256], index: 1, kind: input, shape index: {}]   ;;  %s51_s2 = inlined_call_operand.vmem [shape: f32[1,256], index: 2, kind: output, shape index: {}]  }
   0x1   :  { %v11_v1 = vld [vmem:[%s49_s0] sm:$0x3] }
   0x2   :  { %v12_v2 = vld [vmem:[%s50_s1] sm:$0x3]  ;;  %v13_v3 = vmul.f32 30.0, %v11_v1  ;;  %vm18_vm0 = vcmp.lt.s32.totalorder %v16_v0, 256 }
   0x3   :  { %v14_v4 = vmul.f32 6.0, %v12_v2 }
   0x5   :  { %v15_v5 = vsub.f32 %v13_v3, %v14_v4 }
   0x7   :  { %20 = vst.msk [vmem:[%s51_s2] sm:$0x3] %vm18_vm0, %v15_v5 }

</bundles_post_ra>
